<compile_context>
chip_gen: v7x
topology: tpu7x:2x2x1
jax: 0.10.0
libtpu: 0.0.40
codegen_flags: <defaults>
</compile_context>

<pallas_src>
import math

import jax
import jax.numpy as jnp
from jax.experimental import pallas as pl
from jax.experimental.pallas import tpu as pltpu


def _round_down(v: int, m: int) -> int:
    return (v // m) * m


def _sublane_pack(itemsize: int) -> int:
    # Rows packed per vreg tile: f32 -> 8, bf16/f16 -> 16, int8/fp8 -> 32.
    return {4: 8, 2: 16, 1: 32}.get(itemsize, 8)


def _vmem_budget_and_cap():
    """Generation-aware per-step VMEM budget (all double-buffered blocks) and
    the physical capacity used to clamp vmem_limit_bytes."""
    try:
        cap = int(pltpu.get_tpu_info().vmem_capacity_bytes)
    except Exception:
        cap = 64 << 20  # conservative fallback (v7x physical VMEM)
    # ~1/4 of physical VMEM for our working set leaves headroom for Mosaic
    # internal scratch: ~32 MiB on v5e/v6e (128 MiB VMEM), ~16 MiB on v7x (64 MiB).
    budget = max(8 << 20, cap // 4)
    return budget, cap


def _concat_rows_kernel(*refs):
    """Path A: lane-dense row slabs.

    refs = (*in_refs, out_ref); every ref is a (row_tile, width) VMEM block.
    Slab offsets are static, 128-lane-aligned ints -> unmasked full-width stores.
    """
    *in_refs, o_ref = refs
    off = 0
    for r in in_refs:
        w = r.shape[-1]
        o_ref[:, off:off + w] = r[...]
        off += w


def _concat_channels_kernel(*refs):
    """Path B: (row_tile, C, hw_tile) blocks.

    Every store covers the full lane (spatial-tile) width starting at lane 0;
    only the static sublane (channel) offset varies between inputs.
    """
    *in_refs, o_ref = refs
    off = 0
    for r in in_refs:
        c = r.shape[1]
        o_ref[:, off:off + c, :] = r[...]
        off += c


def concat_samples(xlist, dim: int = 1):
    """Pallas implementation of ConcatSamples.forward (empty recvList case)."""
    assert dim == 1, "ConcatSamples default dim=1 (channel concat) implemented"
    inputs = list(xlist)  # ReceiveSamplesFunc with empty recvList: identity.
    assert len(inputs) >= 1

    # Single previous layer: torch.cat([x], dim=1) == x -> skip the kernel
    # entirely (no HBM round trip, lets XLA fuse downstream).
    if len(inputs) == 1:
        return inputs[0]

    n = int(inputs[0].shape[0])
    rest = tuple(inputs[0].shape[2:])
    dtype = inputs[0].dtype
    for x in inputs:
        assert x.ndim == inputs[0].ndim and x.ndim >= 2
        assert x.shape[0] == n and tuple(x.shape[2:]) == rest
        assert x.dtype == dtype

    chans = [int(x.shape[1]) for x in inputs]
    c_out = sum(chans)
    hw = int(math.prod(rest)) if rest else 1
    itemsize = jnp.dtype(dtype).itemsize
    pack = _sublane_pack(itemsize)
    budget, cap = _vmem_budget_and_cap()

    widths = [c * hw for c in chans]           # lane-dense slab widths
    total_width = c_out * hw
    offs = [0]
    for w in widths[:-1]:
        offs.append(offs[-1] + w)
    # Lane alignment required for unmasked stores in Path A (x2 for bf16,
    # x4 for int8 — conservative w.r.t. sublane packing).
    lane_align = 128 * max(1, 4 // itemsize)
    aligned = all(o % lane_align == 0 for o in offs[1:])

    total_bytes = n * total_width * itemsize
    cost = pl.CostEstimate(flops=0, transcendentals=0,
                           bytes_accessed=2 * total_bytes)

    # Path A needs: >=2 sublane-pack-aligned row blocks (pipelining + v7x
    # TensorCore sharding), the pack-row full-width block within budget, and
    # lane-aligned slab offsets.  2-D inputs (no spatial dims) always use it.
    min_block_bytes = 4 * pack * total_width * itemsize  # (in+out) x dbl buffer
    use_slab_path = (hw == 1) or (
        aligned and n >= 2 * pack and min_block_bytes <= budget)

    if use_slab_path:
        # ---- Path A: lane-dense (N, C_i*H*W) row slabs, grid over rows ----
        flats = [x.reshape(n, -1) for x in inputs]  # row-major metadata reshape
        per_row = max(1, 4 * total_width * itemsize)
        max_rows = max(pack, _round_down(budget // per_row, pack))
        row_tile = min(n, max_rows)
        if row_tile < n:
            row_tile = max(pack, _round_down(row_tile, pack))
        elif n >= 2 * pack:
            # Force >=2 grid steps: software pipelining + v7x core sharding.
            row_tile = max(pack, _round_down(n // 2, pack))
        grid = (pl.cdiv(n, row_tile),)
        in_specs = [pl.BlockSpec((row_tile, w), lambda b: (b, 0)) for w in widths]
        out_spec = pl.BlockSpec((row_tile, total_width), lambda b: (b, 0))
        out_block_bytes = row_tile * total_width * itemsize
        kernel = _concat_rows_kernel
        out_shape = jax.ShapeDtypeStruct((n, total_width), dtype)
        dim_sem = ("parallel",)
        call_inputs = flats
    else:
        # ---- Path B: (N, C, H*W) view, grid over (rows, spatial tiles) ----
        v_ins = [x.reshape(n, c, hw) for x, c in zip(inputs, chans)]
        col_bytes = max(1, 4 * c_out * itemsize)   # per hw-column, (in+out) x dbl buf
        if hw <= 128:
            hw_tile = hw
        else:
            hw_tile = min(hw, max(128, _round_down(budget // col_bytes, 128)))
        row_tile = max(1, min(n, budget // max(1, col_bytes * hw_tile)))
        if pl.cdiv(n, row_tile) * pl.cdiv(hw, hw_tile) < 2:
            # Ensure >=2 grid steps when the data allows it.
            if n >= 2:
                row_tile = max(1, n // 2)
            elif hw_tile > 128:
                hw_tile = max(128, _round_down((hw + 1) // 2, 128))
        grid = (pl.cdiv(n, row_tile), pl.cdiv(hw, hw_tile))
        in_specs = [
            pl.BlockSpec((row_tile, c, hw_tile), lambda b, h: (b, 0, h))
            for c in chans
        ]
        out_spec = pl.BlockSpec((row_tile, c_out, hw_tile), lambda b, h: (b, 0, h))
        out_block_bytes = row_tile * c_out * hw_tile * itemsize
        kernel = _concat_channels_kernel
        out_shape = jax.ShapeDtypeStruct((n, c_out, hw), dtype)
        dim_sem = ("parallel", "parallel")
        call_inputs = v_ins

    # Sum of input blocks == output block; double-buffered both ways, plus
    # slack for Mosaic scratch; clamped to 3/4 of physical VMEM.
    vmem_need = 4 * out_block_bytes
    vmem_limit = int(min(cap * 3 // 4, max(16 << 20, vmem_need + (4 << 20))))

    out = pl.pallas_call(
        kernel,
        out_shape=out_shape,
        grid=grid,
        in_specs=in_specs,
        out_specs=out_spec,
        compiler_params=pltpu.CompilerParams(
            dimension_semantics=dim_sem,
            vmem_limit_bytes=vmem_limit,
        ),
        cost_estimate=cost,
    )(*call_inputs)

    return out.reshape((n, c_out) + rest)


if __name__ == "__main__":
    key = jax.random.PRNGKey(0)
    k1, k2, k3, k4 = jax.random.split(key, 4)

    # Test 1: typical small-batch NCHW channel concat (small N -> spatially
    # tiled Path B with a 2-axis "parallel" grid).
    x1 = jax.random.normal(k1, (2, 4, 16, 16), dtype=jnp.float32)
    x2 = jax.random.normal(k2, (2, 4, 16, 16), dtype=jnp.float32)
    out = jax.block_until_ready(concat_samples([x1, x2], dim=1))
    ref = jnp.concatenate([x1, x2], axis=1)
    assert out.shape == (2, 8, 16, 16)
    assert out.dtype == jnp.float32
    assert jnp.array_equal(out, ref)

    # Test 2: larger batch, unequal channel counts (lane-dense 2-D slab Path A,
    # >=2 pipelined, pack-aligned row blocks).
    x3 = jax.random.normal(k3, (32, 4, 8, 8), dtype=jnp.float32)
    x4 = jax.random.normal(k4, (32, 2, 8, 8), dtype=jnp.float32)
    out2 = jax.block_until_ready(concat_samples([x3, x4], dim=1))
    ref2 = jnp.concatenate([x3, x4], axis=1)
    assert out2.shape == (32, 6, 8, 8)
    assert jnp.array_equal(out2, ref2)

    # Test 3: single previous layer / empty recvList -> identity short-circuit.
    out3 = jax.block_until_ready(concat_samples([x1], dim=1))
    assert jnp.array_equal(out3, x1)

    print("KERNEL_OK")
</pallas_src>

<mosaic_0001>
module attributes {stable_mosaic.version = 11 : i64} {
  func.func @_concat_channels_kernel(%arg0: i32, %arg1: i32, %arg2: memref<1x4x256xf32, #tpu.memory_space<vmem>>, %arg3: memref<1x4x256xf32, #tpu.memory_space<vmem>>, %arg4: memref<1x8x256xf32, #tpu.memory_space<vmem>>) attributes {dimension_semantics = [#tpu.dimension_semantics<parallel>, #tpu.dimension_semantics<parallel>], iteration_bounds = array<i64: 2, 1>, scalar_prefetch = 0 : i64, scratch_operands = 0 : i64, tpu.core_type = #tpu.core_type<tc>, window_params = [{transform_indices = @transform_0, window_bounds = array<i64: 1, 4, 256>}, {transform_indices = @transform_1, window_bounds = array<i64: 1, 4, 256>}, {transform_indices = @transform_2, window_bounds = array<i64: 1, 8, 256>}]} {
    %c0 = arith.constant 0 : index
    %c0_0 = arith.constant 0 : index
    %c0_1 = arith.constant 0 : index
    %0 = vector.load %arg2[%c0, %c0_0, %c0_1] : memref<1x4x256xf32, #tpu.memory_space<vmem>>, vector<1x4x256xf32>
    %c0_2 = arith.constant 0 : index
    %c0_3 = arith.constant 0 : index
    %c0_4 = arith.constant 0 : index
    %1 = vector.load %arg4[%c0_2, %c0_3, %c0_4] : memref<1x8x256xf32, #tpu.memory_space<vmem>>, vector<1x4x256xf32>
    tpu.vector_store %arg4[%c0_2, %c0_3, %c0_4], %0 {strides = array<i32>} : memref<1x8x256xf32, #tpu.memory_space<vmem>>, vector<1x4x256xf32>,
    %c0_5 = arith.constant 0 : index
    %c0_6 = arith.constant 0 : index
    %c0_7 = arith.constant 0 : index
    %2 = vector.load %arg3[%c0_5, %c0_6, %c0_7] : memref<1x4x256xf32, #tpu.memory_space<vmem>>, vector<1x4x256xf32>
    %c0_8 = arith.constant 0 : index
    %c4 = arith.constant 4 : index
    %c0_9 = arith.constant 0 : index
    %3 = vector.load %arg4[%c0_8, %c4, %c0_9] : memref<1x8x256xf32, #tpu.memory_space<vmem>>, vector<1x4x256xf32>
    tpu.vector_store %arg4[%c0_8, %c4, %c0_9], %2 {strides = array<i32>} : memref<1x8x256xf32, #tpu.memory_space<vmem>>, vector<1x4x256xf32>,
    return
  }
  func.func @transform_0(%arg0: i32, %arg1: i32) -> (i32, i32, i32) {
    %c0_i32 = arith.constant 0 : i32
    %c0_i32_0 = arith.constant 0 : i32
    return %arg0, %c0_i32, %arg1 : i32, i32, i32
  }
  func.func @transform_1(%arg0: i32, %arg1: i32) -> (i32, i32, i32) {
    %c0_i32 = arith.constant 0 : i32
    %c0_i32_0 = arith.constant 0 : i32
    return %arg0, %c0_i32, %arg1 : i32, i32, i32
  }
  func.func @transform_2(%arg0: i32, %arg1: i32) -> (i32, i32, i32) {
    %c0_i32 = arith.constant 0 : i32
    %c0_i32_0 = arith.constant 0 : i32
    return %arg0, %c0_i32, %arg1 : i32, i32, i32
  }
}

</mosaic_0001>

<bundles_post_ra>
// kernel: tpu_custom_call.1
= control target key start
LH: loop header
LB: loop body
LE: loop exit
PB: predicated region body
PF: predicated region fallthrough
CT: control target
= control target key end

     0   :  { %7 = vsyncpa [#allocation3], 0  ;;  %s840_s0 = inlined_call_operand.hbm [shape: f32[2,4,256], index: 0, kind: input, shape index: {}]   ;;  %s841_s1 = inlined_call_operand.hbm [shape: f32[2,4,256], index: 1, kind: input, shape index: {}]   ;;  %s842_s2 = inlined_call_operand.hbm [shape: f32[2,8,256], index: 2, kind: output, shape index: {}]  }
   0x1   :  { %9 = vsyncpa [#allocation3 + $0x1], 0 }
   0x2   :  { %10 = vsyncpa [#allocation6], 0 }
   0x3   :  { %12 = vsyncpa [#allocation6 + $0x1], 0 }
   0x4   :  { %13 = vsyncpa [#allocation4], 0 }
   0x5   :  { %15 = vsyncpa [#allocation4 + $0x1], 0  ;;  %s619_s9 = smov 0   ;;  %s621_s10 = smov 0  }
   0x6   :  { %s623_s11 = smov 0   ;;  %s625_s12 = smov 0  }
   0x7   :  { %s627_s13 = smov 0   ;;  %s629_s14 = smov 0  }
   0x8 LB: > { %s362_s15 = sadd.s32 4294967295, %s599_s14   ;;  %s363_s16 = sadd.s32 4294967294, %s599_s14   ;;  %s599_s14 = sphi %s629_s14, %s21_s14   ;;  %s595_s13 = sphi %s627_s13, %s862_s13   ;;  %s591_s12 = sphi %s625_s12, %s861_s12   ;;  %s587_s11 = sphi %s623_s11, %s860_s11   ;;  %s583_s10 = sphi %s621_s10, %s859_s10   ;;  %s579_s9 = sphi %s619_s9, %s858_s9  }
   0x9   : > { %s33_s17 = sadd.s32 1, %s595_s13  ;;  %s42_s18 = sadd.s32 1, %s587_s11 }
   0xa   : > { %p35_p0 = scmp.ge.s32.totalorder %s33_s17, 2  ;;  %p49_p1 = scmp.ne.s32.totalorder %s587_s11, %s583_s10 }
   0xb   : > { %p50_p2 = scmp.eq.s32.totalorder %s599_s14, 0  ;;  %p55_p3 = scmp.ne.s32.totalorder %s583_s10, %s579_s9 }
   0xc   : > { %s864_s17 = smov (%p35_p0, %s33_s17), 0  ;;  %p56_p5 = scmp.eq.s32.totalorder %s362_s15, 0 }
   0xd   : > { %p660_p4 = por %p50_p2, %p49_p1  ;;  %s37_s20 = ssub.s32 %s595_s13, %s864_s17 }
   0xe   : > { %p109_p6 = scmp.eq.s32.totalorder %s362_s15, 1  ;;  %p40_p7 = scmp.eq.s32.totalorder %s37_s20, 0 }
   0xf   : > { %p666_p8 = por %p56_p5, %p55_p3  ;;  %p115_p10 = scmp.eq.s32.totalorder %s363_s16, 1 }
  0x10   : > { %p670_p9 = por %p109_p6, %p49_p1  ;;  %p401_p13 = scmp.lt.s32.totalorder %s599_s14, 2 }
  0x11   : > { %s846_s21 = scalar_select %p666_p8, 1, 0 }
  0x12   : > { %s847_s22 = scalar_select %p670_p9, 1, 0 }
  0x13   : > { %s675_s23 = scalar_select %p40_p7, %s587_s11, %s42_s18  }
  0x14   : > { %p677_p11 = por %p115_p10, %p55_p3  ;;  %s684_s25 = sand.u32 1, %s587_s11  }
  0x15   : > { %s366_s26 = sshll.u32 %s684_s25, 3  ;;  %s381_s27 = sshll.u32 %s595_s13, 7 }
  0x16   : > { %s848_s24 = scalar_select %p677_p11, 1, 0 }
  0x17   : > { %s693_s30 = scalar_lea.hbm %s840_s0, %s381_s27  ;;  %s139_s3 = scalar_lea.vmem [#allocation2], %s366_s26 }
  0x18   : > { %s149_s4 = sshll.u32 %s139_s3, 4  ;;  %p701_p0 = pnand %p401_p13, %p660_p4  ;;  %s697_s4 = int_to_ptr.vmem [resolvable:$true] %s149_s4 }
  0x19   : > { %s136_s6 = scalar_lea.sflag [#allocation3], %s684_s25  ;;  %s453_s7 = scalar_lea.hbm %s693_s30, 128 }
  0x1a   : > { %p454_p3 = scmp.ne.s32.totalorder %s693_s30, %s453_s7  ;;  %p455_p5 = pneg %p701_p0 }
  0x1b   : > { %s458_s16 = scalar_lea.hbm %s840_s0, 256  ;;  %p459_p4 = scmp.lt.u32.totalorder %s693_s30, %s840_s0 }
  0x1c   : > { %p456_p6 = pnand %p455_p5, %p454_p3  ;;  %p460_p10 = scmp.lt.u32.totalorder %s458_s16, %s453_s7 }
  0x1d   : > { %p462_p12 = scmp.lt.u32.totalorder %s453_s7, %s693_s30 }
  0x1e   : > { %p457_p7 = pneg %p456_p6  ;;  %p461_p13 = por %p460_p10, %p459_p4 }
  0x20   : > { %p463_p1 = por %p462_p12, %p461_p13 }
  0x22   : > { %p464_p2 = pnand %p463_p1, %p457_p7 }
  0x24   : > { %467 = shalt.err (!%p464_p2)
}
  0x25   : > { %s468_s20 = scalar_lea.vmem %s697_s4, 128  ;;  %s601_s28 = smov [#allocation2]  }
  0x26   : > { %p469_p3 = scmp.ne.s32.totalorder %s697_s4, %s468_s20  ;;  %s473_s29 = sshll.u32 %s601_s28, 4  ;;  %s474_s29 = int_to_ptr.vmem [resolvable:$false] %s473_s29 }
  0x27   : > { %s475_s3 = scalar_lea.vmem %s474_s29, 256  ;;  %p476_p9 = scmp.lt.s32.totalorder %s697_s4, %s474_s29 }
  0x28   : > { %p471_p6 = pnand %p469_p3, %p455_p5  ;;  %p477_p4 = scmp.lt.s32.totalorder %s475_s3, %s468_s20 }
  0x2a   : > { %p472_p11 = pneg %p471_p6  ;;  %p478_p10 = por %p477_p4, %p476_p9 }
  0x2c   : > { %p479_p12 = pnand %p478_p10, %p472_p11 }
  0x2e   : > { %482 = shalt.err (!%p479_p12)
}
  0x2f   : > { %393 = dma.hbm_to_vmem [thread:$0]  (!%p701_p0), %s693_s30, 128, %s697_s4, %s136_s6  }
  0x30   : > { %p850_p1 = scmp.lt.s32.totalorder %s599_s14, 3  ;;  %p851_p2 = scmp.ge.s32.totalorder %s599_s14, 1 }
  0x31   : > { %s746_s16 = scalar_lea.hbm %s841_s1, %s381_s27  ;;  %s160_s18 = scalar_lea.vmem [#allocation5], %s366_s26 }
  0x32   : > { %p737_p7 = pnand %p851_p2, %p850_p1  ;;  %s170_s19 = sshll.u32 %s160_s18, 4  ;;  %s171_s19 = int_to_ptr.vmem [resolvable:$true] %s170_s19 }
  0x33   : > { %s157_s30 = scalar_lea.sflag [#allocation6], %s684_s25  ;;  %s483_s4 = scalar_lea.hbm %s746_s16, 128 }
  0x34   : > { %s852_s7 = scalar_select %p737_p7, 1, 0 }
  0x35   : > { %p484_p9 = scmp.ne.s32.totalorder %s746_s16, %s483_s4  ;;  %s488_s27 = scalar_lea.hbm %s841_s1, 256 }
  0x36   : > { %p489_p3 = scmp.lt.u32.totalorder %s746_s16, %s841_s1  ;;  %p490_p6 = scmp.lt.u32.totalorder %s488_s27, %s483_s4 }
  0x37   : > { %p486_p11 = pnand %p484_p9, %p455_p5  ;;  %p492_p10 = scmp.lt.u32.totalorder %s483_s4, %s746_s16 }
  0x38   : > { %p491_p4 = por %p490_p6, %p489_p3 }
  0x39   : > { %p487_p13 = pneg %p486_p11 }
  0x3a   : > { %p493_p12 = por %p492_p10, %p491_p4 }
  0x3c   : > { %p494_p1 = pnand %p493_p12, %p487_p13 }
  0x3e   : > { %497 = shalt.err (!%p494_p1)
}
  0x3f   : > { %s498_s25 = scalar_lea.vmem %s171_s19, 128  ;;  %s602_s26 = smov [#allocation5]  }
  0x40   : > { %p499_p2 = scmp.ne.s32.totalorder %s171_s19, %s498_s25  ;;  %s503_s3 = sshll.u32 %s602_s26, 4  ;;  %s504_s3 = int_to_ptr.vmem [resolvable:$false] %s503_s3 }
  0x41   : > { %s505_s8 = scalar_lea.vmem %s504_s3, 256  ;;  %p506_p8 = scmp.lt.s32.totalorder %s171_s19, %s504_s3 }
  0x42   : > { %p501_p9 = pnand %p499_p2, %p455_p5  ;;  %p507_p7 = scmp.lt.s32.totalorder %s505_s8, %s498_s25 }
  0x44   : > { %p502_p11 = pneg %p501_p9  ;;  %p508_p3 = por %p507_p7, %p506_p8 }
  0x46   : > { %p509_p6 = pnand %p508_p3, %p502_p11 }
  0x48   : > { %512 = shalt.err (!%p509_p6)
}
  0x49   : > { %396 = dma.hbm_to_vmem [thread:$0]  (!%p701_p0), %s746_s16, 128, %s171_s19, %s157_s30  }
  0x4a   : > { %p853_p13 = scmp.ne.s32.totalorder %s852_s7, 0 }
  0x4b   : > { %s773_s15 = sand.u32 (!%p853_p13), 1, %s583_s10   ;;  %p854_p5 = scmp.ne.s32.totalorder (!%p853_p13), %s846_s21, 0 }
  0x4c   : > { %179 = sbr.rel (%p853_p13) target bundleno = 112 (0x70), region = 28  ;;  %s373_s18 = sshll.u32 (!%p853_p13), %s773_s15, 3 }
  0x4d   : > { %s182_s4 = scalar_lea.sflag (!%p853_p13), [#allocation3], %s773_s15  ;;  %s185_s6 = scalar_lea.vmem (!%p853_p13), [#allocation2], %s373_s18 }
  0x53   : > { %566 = dma.done.wait (%p854_p5), %s182_s4, 128  }
  0x54   : > { %568 = vsyncadd (%p854_p5), %s182_s4, 4294967168  ;;  %s191_s5 = scalar_lea.sflag [#allocation6], %s773_s15  ;;  %s194_s16 = scalar_lea.vmem [#allocation5], %s373_s18 }
  0x55   : > { %570 = dma.done.wait (%p854_p5), %s191_s5, 128  }
  0x56   : > { %572 = vsyncadd (%p854_p5), %s191_s5, 4294967168  ;;  %s375_s7 = sshll.u32 %s773_s15, 4  ;;  %s383_s20 = sshll.u32 %s591_s12, 8  ;;  %v223_v0 = vld [vmem:[%s185_s6] sm:$0xff]  ;;  %v229_v1 = vld [vmem:[%s194_s16] sm:$0xff] }
  0x57   : > { %s219_s19 = scalar_lea.vmem [#allocation7], %s375_s7  ;;  %v225_v2 = vcombine.high %v223_v0, %v223_v0  ;;  %v231_v3 = vcombine.low %v229_v1, %v229_v1  ;;  %s793_s28 = scalar_lea.hbm %s842_s2, %s383_s20 }
  0x58   : > { %s252_s30 = sshll.u32 %s219_s19, 4  ;;  %227 = vst [vmem:[%s219_s19] sm:$0xf] %v223_v0  ;;  %234 = vst [vmem:[%s219_s19 + $0x8] sm:$0xf0] %v229_v1  ;;  %s236_s29 = scalar_lea.sflag [#allocation4], %s773_s15  ;;  %s788_s30 = int_to_ptr.vmem [resolvable:$true] %s252_s30 }
  0x59   : > { %228 = vst [vmem:[%s219_s19 + $0x8] sm:$0xf] %v225_v2  ;;  %233 = vst [vmem:[%s219_s19] sm:$0xf0] %v231_v3  ;;  %s513_s12 = scalar_lea.vmem %s788_s30, 256  ;;  %p855_p0 = scmp.ne.s32.totalorder %s847_s22, 0 }
  0x5a   : > { %p514_p8 = scmp.ne.s32.totalorder %s788_s30, %s513_s12  ;;  %s603_s25 = smov [#allocation7]  }
  0x5b   : > { %s517_s26 = sshll.u32 %s603_s25, 4  ;;  %s518_s26 = int_to_ptr.vmem [resolvable:$false] %s517_s26 }
  0x5c   : > { %p515_p7 = pnand %p514_p8, %p855_p0  ;;  %s519_s3 = scalar_lea.vmem %s518_s26, 512 }
  0x5d   : > { %p520_p10 = scmp.lt.s32.totalorder %s788_s30, %s518_s26  ;;  %p521_p12 = scmp.lt.s32.totalorder %s519_s3, %s513_s12 }
  0x5e   : > { %p516_p4 = pneg %p515_p7 }
  0x5f   : > { %p522_p1 = por %p521_p12, %p520_p10 }
  0x61   : > { %p523_p2 = pnand %p522_p1, %p516_p4 }
  0x63   : > { %526 = shalt.err (!%p523_p2)
}
  0x64   : > { %s527_s8 = scalar_lea.hbm %s793_s28, 256  ;;  %s531_s4 = scalar_lea.hbm %s842_s2, 512 }
  0x65   : > { %p528_p9 = scmp.ne.s32.totalorder %s793_s28, %s527_s8  ;;  %p532_p6 = scmp.lt.u32.totalorder %s793_s28, %s842_s2 }
  0x66   : > { %p533_p13 = scmp.lt.u32.totalorder %s531_s4, %s527_s8  ;;  %p535_p8 = scmp.lt.u32.totalorder %s527_s8, %s793_s28 }
  0x67   : > { %p529_p11 = pnand %p528_p9, %p855_p0 }
  0x68   : > { %p534_p5 = por %p533_p13, %p532_p6 }
  0x69   : > { %p530_p3 = pneg %p529_p11 }
  0x6a   : > { %p536_p7 = por %p535_p8, %p534_p5 }
  0x6c   : > { %p537_p4 = pnand %p536_p7, %p530_p3 }
  0x6e   : > { %540 = shalt.err (!%p537_p4)
}
  0x6f   : > { %388 = dma.vmem_to_hbm [thread:$0]  (%p855_p0), %s788_s30, 256, %s793_s28, %s236_s29  }
  0x70 PF: > { %s264_s16 = sand.u32 1, %s579_s9   ;;  %p856_p10 = scmp.ne.s32.totalorder %s848_s24, 0 }
  0x71   : > { %p857_p12 = scmp.ge.s32.totalorder %s599_s14, 2  ;;  %s265_s7 = scalar_lea.sflag [#allocation4], %s264_s16 }
  0x73   : > { %p398_p1 = pnand %p857_p12, %p856_p10 }
  0x75   : > { %574 = dma.done.wait (!%p398_p1), %s265_s7, 256  }
  0x76   : > { %576 = vsyncadd (!%p398_p1), %s265_s7, 4294967040  ;;  %s21_s14 = sadd.s32 1, %s599_s14   ;;  %s858_s9 = smov %s583_s10 }
  0x77   : > { %p18_p2 = scmp.ge.s32.totalorder %s21_s14, 4   ;;  %s859_s10 = smov %s587_s11 }
  0x78   : > { %s860_s11 = smov %s675_s23  ;;  %s861_s12 = smov %s595_s13 }
  0x79   : > { %s862_s13 = smov %s864_s17  ;;  %20 = sbr.rel (!%p18_p2) target bundleno = 8 (0x8), region = 86 }
  0x80   :  { %270 = vsyncpa [#allocation3], 1 }
  0x81   :  { %272 = vsyncpa [#allocation3 + $0x1], 1 }
  0x82   :  { %273 = vsyncpa [#allocation6], 1 }
  0x83   :  { %275 = vsyncpa [#allocation6 + $0x1], 1 }
  0x84   :  { %276 = vsyncpa [#allocation4], 1 }
  0x85   :  { %278 = vsyncpa [#allocation4 + $0x1], 1 }

</bundles_post_ra>
